<compile_context>
chip_gen: v7x
topology: tpu7x:2x2x1
jax: 0.10.0
libtpu: 0.0.40
codegen_flags: <defaults>
</compile_context>

<pallas_src>
import jax
import jax.numpy as jnp
from jax.experimental import pallas as pl
from jax.experimental.pallas import tpu as pltpu


def simple_rnn_kernel(tokens_ref, emb_ref, wih_ref, b_ref, whh_ref, wfc_ref, bfc_ref,
                      out_ref, embproj_ref, xall_ref):
    """Single-program kernel (no grid); everything is VMEM/SMEM resident.

    tokens_ref  : SMEM [B, T]        int32   token ids
    emb_ref     : VMEM [V, E]        f32     embedding table
    wih_ref     : VMEM [E, H]        f32     W_ih^T
    b_ref       : VMEM [1, H]        f32     b_ih + b_hh (combined)
    whh_ref     : VMEM [H, H]        f32     W_hh^T
    wfc_ref     : VMEM [H, O]        f32     W_fc^T
    bfc_ref     : VMEM [1, O]        f32     b_fc
    out_ref     : VMEM [B_pad, O]    f32     logits (rows >= B are padding)
    embproj_ref : VMEM [V, H]        f32     scratch: pre-projected embedding table
    xall_ref    : VMEM [T*B_pad, H]  f32     scratch: time-major gathered inputs
    """
    B, T = tokens_ref.shape
    B_pad = out_ref.shape[0]

    # (1) Pre-projected embedding table (one tiny MXU matmul + bias, off the serial chain).
    embproj_ref[...] = (
        jnp.dot(emb_ref[...], wih_ref[...], preferred_element_type=jnp.float32)
        + b_ref[...])

    # (2) In-kernel token gather into a sublane-aligned, time-major scratch.
    #     Pad rows are zeroed; batch rows never mix in the recurrence, so padding
    #     cannot contaminate the real rows.
    xall_ref[...] = jnp.zeros_like(xall_ref)
    for t in range(T):
        for b in range(B):
            tok = tokens_ref[b, t]                                     # SMEM scalar read
            xall_ref[t * B_pad + b:t * B_pad + b + 1, :] = (
                embproj_ref[pl.ds(tok, 1), :])                         # dynamic row gather

    # (3) Recurrence: hidden state lives in vregs; fully unrolled (static T).
    #     Each per-step slice starts at a multiple of 8 -> whole-vreg sublane reads.
    # TODO(synk): hold W_hh in the MXU across steps (pltpu.matmul_push_rhs /
    #             matmul_acc_lhs / matmul_pop) to drop the per-step weight reload
    #             on v5e/v6e; kept as portable jnp.dot here.
    h = jnp.zeros((B_pad, whh_ref.shape[0]), jnp.float32)
    for t in range(T):
        x_t = xall_ref[t * B_pad:(t + 1) * B_pad, :]                   # aligned static slice
        h = jnp.tanh(x_t + jnp.dot(h, whh_ref[...],
                                   preferred_element_type=jnp.float32))

    # (4) Final linear layer on h_T.
    out_ref[...] = (jnp.dot(h, wfc_ref[...], preferred_element_type=jnp.float32)
                    + bfc_ref[...])


def simple_rnn_forward(tokens, embedding, w_ih, w_hh, b_ih, b_hh, w_fc, b_fc):
    """Wrapper: one fused pallas_call (gather + input proj + recurrence + FC).

    tokens:    [B, T] int32
    embedding: [V, E]
    w_ih:      [H, E]   (PyTorch layout)
    w_hh:      [H, H]
    b_ih,b_hh: [H]
    w_fc:      [O, H]   (PyTorch layout)
    b_fc:      [O]
    returns:   [B, O] float32
    """
    B, T = tokens.shape
    V, _ = embedding.shape
    H = w_hh.shape[0]
    O = w_fc.shape[0]
    B_pad = 8  # one sublane group

    # One-time weight prep (in a real model these would be cached at init, not per call).
    wih_t = jnp.asarray(w_ih.T, jnp.float32)                   # [E, H]
    whh_t = jnp.asarray(w_hh.T, jnp.float32)                   # [H, H]
    b = jnp.asarray((b_ih + b_hh)[None, :], jnp.float32)       # [1, H]
    wfc_t = jnp.asarray(w_fc.T, jnp.float32)                   # [H, O]
    bfc = jnp.asarray(b_fc[None, :], jnp.float32)              # [1, O]

    vmem = pl.BlockSpec(memory_space=pltpu.MemorySpace.VMEM)
    smem = pl.BlockSpec(memory_space=pltpu.MemorySpace.SMEM)

    out_pad = pl.pallas_call(
        simple_rnn_kernel,
        out_shape=jax.ShapeDtypeStruct((B_pad, O), jnp.float32),
        in_specs=[smem, vmem, vmem, vmem, vmem, vmem, vmem],
        out_specs=vmem,
        scratch_shapes=[
            pltpu.VMEM((V, H), jnp.float32),          # pre-projected embedding table
            pltpu.VMEM((T * B_pad, H), jnp.float32),  # gathered time-major inputs
        ],
    )(tokens.astype(jnp.int32), embedding.astype(jnp.float32),
      wih_t, b, whh_t, wfc_t, bfc)

    # TODO(synk): when B/T scale up, split the batch across v7x's two TensorCores
    #             (grid=(2,), dimension_semantics=("parallel",)) and stream x per
    #             time block to respect v7x's 64 MiB VMEM.
    return out_pad[:B, :]


def _reference_forward(tokens, embedding, w_ih, w_hh, b_ih, b_hh, w_fc, b_fc):
    """Pure-JAX f32 reference of the PyTorch forward (for sanity checking)."""
    x = jnp.take(embedding, tokens, axis=0)  # [B, T, E]
    B, T, _ = x.shape
    H = w_hh.shape[0]
    h = jnp.zeros((B, H), jnp.float32)
    for t in range(T):
        h = jnp.tanh(x[:, t, :] @ w_ih.T + b_ih + h @ w_hh.T + b_hh)
    return h @ w_fc.T + b_fc


if __name__ == "__main__":
    # Small, deterministic configuration consistent with the module.
    B, T = 2, 8
    vocab_size = 16
    embed_dim = 32
    hidden_size = 32
    output_size = vocab_size  # char-level LM head

    key = jax.random.PRNGKey(0)
    keys = jax.random.split(key, 8)

    # Deterministic parameter init (uniform ±1/sqrt(H), PyTorch-style).
    bound = 1.0 / jnp.sqrt(jnp.float32(hidden_size))
    embedding = jax.random.normal(keys[0], (vocab_size, embed_dim), jnp.float32)
    w_ih = jax.random.uniform(keys[1], (hidden_size, embed_dim), jnp.float32, -bound, bound)
    w_hh = jax.random.uniform(keys[2], (hidden_size, hidden_size), jnp.float32, -bound, bound)
    b_ih = jax.random.uniform(keys[3], (hidden_size,), jnp.float32, -bound, bound)
    b_hh = jax.random.uniform(keys[4], (hidden_size,), jnp.float32, -bound, bound)
    w_fc = jax.random.uniform(keys[5], (output_size, hidden_size), jnp.float32, -bound, bound)
    b_fc = jax.random.uniform(keys[6], (output_size,), jnp.float32, -bound, bound)

    tokens = jax.random.randint(keys[7], (B, T), 0, vocab_size, jnp.int32)

    out = simple_rnn_forward(tokens, embedding, w_ih, w_hh, b_ih, b_hh, w_fc, b_fc)
    out = jax.block_until_ready(out)

    ref = _reference_forward(tokens, embedding, w_ih, w_hh, b_ih, b_hh, w_fc, b_fc)
    assert out.shape == (B, output_size)
    # All-f32 kernel; loose-ish tolerance only to cover MXU default-precision matmuls.
    assert jnp.allclose(out, ref, atol=2e-2, rtol=1e-2), float(jnp.max(jnp.abs(out - ref)))

    print("KERNEL_OK")
</pallas_src>

<mosaic_0001>
module attributes {stable_mosaic.version = 11 : i64} {
  func.func @simple_rnn_kernel(%arg0: memref<2x8xi32, #tpu.memory_space<smem>>, %arg1: memref<16x32xf32, #tpu.memory_space<vmem>>, %arg2: memref<32x32xf32, #tpu.memory_space<vmem>>, %arg3: memref<1x32xf32, #tpu.memory_space<vmem>>, %arg4: memref<32x32xf32, #tpu.memory_space<vmem>>, %arg5: memref<32x16xf32, #tpu.memory_space<vmem>>, %arg6: memref<1x16xf32, #tpu.memory_space<vmem>>, %arg7: memref<8x16xf32, #tpu.memory_space<vmem>>, %arg8: memref<16x32xf32, #tpu.memory_space<vmem>>, %arg9: memref<64x32xf32, #tpu.memory_space<vmem>>) attributes {dimension_semantics = [], scalar_prefetch = 0 : i64, scratch_operands = 2 : i64, tpu.core_type = #tpu.core_type<tc>} {
    %c0 = arith.constant 0 : index
    %c0_0 = arith.constant 0 : index
    %0 = vector.load %arg1[%c0, %c0_0] : memref<16x32xf32, #tpu.memory_space<vmem>>, vector<16x32xf32>
    %c0_1 = arith.constant 0 : index
    %c0_2 = arith.constant 0 : index
    %1 = vector.load %arg2[%c0_1, %c0_2] : memref<32x32xf32, #tpu.memory_space<vmem>>, vector<32x32xf32>
    %cst = arith.constant dense<0.000000e+00> : vector<16x32xf32>
    %2 = tpu.matmul %0, %1, %cst {dimension_numbers = #tpu.dot_dimension_numbers<[1], [0], [0], [1], [0, 0, 1, 1], [], []>} : vector<16x32xf32>, vector<32x32xf32>, vector<16x32xf32> -> vector<16x32xf32>
    %c0_3 = arith.constant 0 : index
    %c0_4 = arith.constant 0 : index
    %3 = vector.load %arg3[%c0_3, %c0_4] : memref<1x32xf32, #tpu.memory_space<vmem>>, vector<1x32xf32>
    %4 = vector.broadcast %3 : vector<1x32xf32> to vector<16x32xf32>
    %5 = arith.addf %2, %4 : vector<16x32xf32>
    %c0_5 = arith.constant 0 : index
    %c0_6 = arith.constant 0 : index
    %6 = vector.load %arg8[%c0_5, %c0_6] : memref<16x32xf32, #tpu.memory_space<vmem>>, vector<16x32xf32>
    tpu.vector_store %arg8[%c0_5, %c0_6], %5 {strides = array<i32>} : memref<16x32xf32, #tpu.memory_space<vmem>>, vector<16x32xf32>,
    %cst_7 = arith.constant 0.000000e+00 : f32
    %7 = vector.broadcast %cst_7 : f32 to vector<64x32xf32>
    %c0_8 = arith.constant 0 : index
    %c0_9 = arith.constant 0 : index
    %8 = vector.load %arg9[%c0_8, %c0_9] : memref<64x32xf32, #tpu.memory_space<vmem>>, vector<64x32xf32>
    tpu.vector_store %arg9[%c0_8, %c0_9], %7 {strides = array<i32>} : memref<64x32xf32, #tpu.memory_space<vmem>>, vector<64x32xf32>,
    %c0_10 = arith.constant 0 : index
    %c0_11 = arith.constant 0 : index
    %9 = memref.load %arg0[%c0_10, %c0_11] : memref<2x8xi32, #tpu.memory_space<smem>>
    %10 = arith.index_cast %9 : i32 to index
    %c0_12 = arith.constant 0 : index
    %11 = vector.load %arg8[%10, %c0_12] : memref<16x32xf32, #tpu.memory_space<vmem>>, vector<1x32xf32>
    %c0_13 = arith.constant 0 : index
    %c0_14 = arith.constant 0 : index
    %12 = vector.load %arg9[%c0_13, %c0_14] : memref<64x32xf32, #tpu.memory_space<vmem>>, vector<1x32xf32>
    tpu.vector_store %arg9[%c0_13, %c0_14], %11 {strides = array<i32>} : memref<64x32xf32, #tpu.memory_space<vmem>>, vector<1x32xf32>,
    %c1 = arith.constant 1 : index
    %c0_15 = arith.constant 0 : index
    %13 = memref.load %arg0[%c1, %c0_15] : memref<2x8xi32, #tpu.memory_space<smem>>
    %14 = arith.index_cast %13 : i32 to index
    %c0_16 = arith.constant 0 : index
    %15 = vector.load %arg8[%14, %c0_16] : memref<16x32xf32, #tpu.memory_space<vmem>>, vector<1x32xf32>
    %c1_17 = arith.constant 1 : index
    %c0_18 = arith.constant 0 : index
    %16 = vector.load %arg9[%c1_17, %c0_18] : memref<64x32xf32, #tpu.memory_space<vmem>>, vector<1x32xf32>
    tpu.vector_store %arg9[%c1_17, %c0_18], %15 {strides = array<i32>} : memref<64x32xf32, #tpu.memory_space<vmem>>, vector<1x32xf32>,
    %c0_19 = arith.constant 0 : index
    %c1_20 = arith.constant 1 : index
    %17 = memref.load %arg0[%c0_19, %c1_20] : memref<2x8xi32, #tpu.memory_space<smem>>
    %18 = arith.index_cast %17 : i32 to index
    %c0_21 = arith.constant 0 : index
    %19 = vector.load %arg8[%18, %c0_21] : memref<16x32xf32, #tpu.memory_space<vmem>>, vector<1x32xf32>
    %c8 = arith.constant 8 : index
    %c0_22 = arith.constant 0 : index
    %20 = vector.load %arg9[%c8, %c0_22] : memref<64x32xf32, #tpu.memory_space<vmem>>, vector<1x32xf32>
    tpu.vector_store %arg9[%c8, %c0_22], %19 {strides = array<i32>} : memref<64x32xf32, #tpu.memory_space<vmem>>, vector<1x32xf32>,
    %c1_23 = arith.constant 1 : index
    %c1_24 = arith.constant 1 : index
    %21 = memref.load %arg0[%c1_23, %c1_24] : memref<2x8xi32, #tpu.memory_space<smem>>
    %22 = arith.index_cast %21 : i32 to index
    %c0_25 = arith.constant 0 : index
    %23 = vector.load %arg8[%22, %c0_25] : memref<16x32xf32, #tpu.memory_space<vmem>>, vector<1x32xf32>
    %c9 = arith.constant 9 : index
    %c0_26 = arith.constant 0 : index
    %24 = vector.load %arg9[%c9, %c0_26] : memref<64x32xf32, #tpu.memory_space<vmem>>, vector<1x32xf32>
    tpu.vector_store %arg9[%c9, %c0_26], %23 {strides = array<i32>} : memref<64x32xf32, #tpu.memory_space<vmem>>, vector<1x32xf32>,
    %c0_27 = arith.constant 0 : index
    %c2 = arith.constant 2 : index
    %25 = memref.load %arg0[%c0_27, %c2] : memref<2x8xi32, #tpu.memory_space<smem>>
    %26 = arith.index_cast %25 : i32 to index
    %c0_28 = arith.constant 0 : index
    %27 = vector.load %arg8[%26, %c0_28] : memref<16x32xf32, #tpu.memory_space<vmem>>, vector<1x32xf32>
    %c16 = arith.constant 16 : index
    %c0_29 = arith.constant 0 : index
    %28 = vector.load %arg9[%c16, %c0_29] : memref<64x32xf32, #tpu.memory_space<vmem>>, vector<1x32xf32>
    tpu.vector_store %arg9[%c16, %c0_29], %27 {strides = array<i32>} : memref<64x32xf32, #tpu.memory_space<vmem>>, vector<1x32xf32>,
    %c1_30 = arith.constant 1 : index
    %c2_31 = arith.constant 2 : index
    %29 = memref.load %arg0[%c1_30, %c2_31] : memref<2x8xi32, #tpu.memory_space<smem>>
    %30 = arith.index_cast %29 : i32 to index
    %c0_32 = arith.constant 0 : index
    %31 = vector.load %arg8[%30, %c0_32] : memref<16x32xf32, #tpu.memory_space<vmem>>, vector<1x32xf32>
    %c17 = arith.constant 17 : index
    %c0_33 = arith.constant 0 : index
    %32 = vector.load %arg9[%c17, %c0_33] : memref<64x32xf32, #tpu.memory_space<vmem>>, vector<1x32xf32>
    tpu.vector_store %arg9[%c17, %c0_33], %31 {strides = array<i32>} : memref<64x32xf32, #tpu.memory_space<vmem>>, vector<1x32xf32>,
    %c0_34 = arith.constant 0 : index
    %c3 = arith.constant 3 : index
    %33 = memref.load %arg0[%c0_34, %c3] : memref<2x8xi32, #tpu.memory_space<smem>>
    %34 = arith.index_cast %33 : i32 to index
    %c0_35 = arith.constant 0 : index
    %35 = vector.load %arg8[%34, %c0_35] : memref<16x32xf32, #tpu.memory_space<vmem>>, vector<1x32xf32>
    %c24 = arith.constant 24 : index
    %c0_36 = arith.constant 0 : index
    %36 = vector.load %arg9[%c24, %c0_36] : memref<64x32xf32, #tpu.memory_space<vmem>>, vector<1x32xf32>
    tpu.vector_store %arg9[%c24, %c0_36], %35 {strides = array<i32>} : memref<64x32xf32, #tpu.memory_space<vmem>>, vector<1x32xf32>,
    %c1_37 = arith.constant 1 : index
    %c3_38 = arith.constant 3 : index
    %37 = memref.load %arg0[%c1_37, %c3_38] : memref<2x8xi32, #tpu.memory_space<smem>>
    %38 = arith.index_cast %37 : i32 to index
    %c0_39 = arith.constant 0 : index
    %39 = vector.load %arg8[%38, %c0_39] : memref<16x32xf32, #tpu.memory_space<vmem>>, vector<1x32xf32>
    %c25 = arith.constant 25 : index
    %c0_40 = arith.constant 0 : index
    %40 = vector.load %arg9[%c25, %c0_40] : memref<64x32xf32, #tpu.memory_space<vmem>>, vector<1x32xf32>
    tpu.vector_store %arg9[%c25, %c0_40], %39 {strides = array<i32>} : memref<64x32xf32, #tpu.memory_space<vmem>>, vector<1x32xf32>,
    %c0_41 = arith.constant 0 : index
    %c4 = arith.constant 4 : index
    %41 = memref.load %arg0[%c0_41, %c4] : memref<2x8xi32, #tpu.memory_space<smem>>
    %42 = arith.index_cast %41 : i32 to index
    %c0_42 = arith.constant 0 : index
    %43 = vector.load %arg8[%42, %c0_42] : memref<16x32xf32, #tpu.memory_space<vmem>>, vector<1x32xf32>
    %c32 = arith.constant 32 : index
    %c0_43 = arith.constant 0 : index
    %44 = vector.load %arg9[%c32, %c0_43] : memref<64x32xf32, #tpu.memory_space<vmem>>, vector<1x32xf32>
    tpu.vector_store %arg9[%c32, %c0_43], %43 {strides = array<i32>} : memref<64x32xf32, #tpu.memory_space<vmem>>, vector<1x32xf32>,
    %c1_44 = arith.constant 1 : index
    %c4_45 = arith.constant 4 : index
    %45 = memref.load %arg0[%c1_44, %c4_45] : memref<2x8xi32, #tpu.memory_space<smem>>
    %46 = arith.index_cast %45 : i32 to index
    %c0_46 = arith.constant 0 : index
    %47 = vector.load %arg8[%46, %c0_46] : memref<16x32xf32, #tpu.memory_space<vmem>>, vector<1x32xf32>
    %c33 = arith.constant 33 : index
    %c0_47 = arith.constant 0 : index
    %48 = vector.load %arg9[%c33, %c0_47] : memref<64x32xf32, #tpu.memory_space<vmem>>, vector<1x32xf32>
    tpu.vector_store %arg9[%c33, %c0_47], %47 {strides = array<i32>} : memref<64x32xf32, #tpu.memory_space<vmem>>, vector<1x32xf32>,
    %c0_48 = arith.constant 0 : index
    %c5 = arith.constant 5 : index
    %49 = memref.load %arg0[%c0_48, %c5] : memref<2x8xi32, #tpu.memory_space<smem>>
    %50 = arith.index_cast %49 : i32 to index
    %c0_49 = arith.constant 0 : index
    %51 = vector.load %arg8[%50, %c0_49] : memref<16x32xf32, #tpu.memory_space<vmem>>, vector<1x32xf32>
    %c40 = arith.constant 40 : index
    %c0_50 = arith.constant 0 : index
    %52 = vector.load %arg9[%c40, %c0_50] : memref<64x32xf32, #tpu.memory_space<vmem>>, vector<1x32xf32>
    tpu.vector_store %arg9[%c40, %c0_50], %51 {strides = array<i32>} : memref<64x32xf32, #tpu.memory_space<vmem>>, vector<1x32xf32>,
    %c1_51 = arith.constant 1 : index
    %c5_52 = arith.constant 5 : index
    %53 = memref.load %arg0[%c1_51, %c5_52] : memref<2x8xi32, #tpu.memory_space<smem>>
    %54 = arith.index_cast %53 : i32 to index
    %c0_53 = arith.constant 0 : index
    %55 = vector.load %arg8[%54, %c0_53] : memref<16x32xf32, #tpu.memory_space<vmem>>, vector<1x32xf32>
    %c41 = arith.constant 41 : index
    %c0_54 = arith.constant 0 : index
    %56 = vector.load %arg9[%c41, %c0_54] : memref<64x32xf32, #tpu.memory_space<vmem>>, vector<1x32xf32>
    tpu.vector_store %arg9[%c41, %c0_54], %55 {strides = array<i32>} : memref<64x32xf32, #tpu.memory_space<vmem>>, vector<1x32xf32>,
    %c0_55 = arith.constant 0 : index
    %c6 = arith.constant 6 : index
    %57 = memref.load %arg0[%c0_55, %c6] : memref<2x8xi32, #tpu.memory_space<smem>>
    %58 = arith.index_cast %57 : i32 to index
    %c0_56 = arith.constant 0 : index
    %59 = vector.load %arg8[%58, %c0_56] : memref<16x32xf32, #tpu.memory_space<vmem>>, vector<1x32xf32>
    %c48 = arith.constant 48 : index
    %c0_57 = arith.constant 0 : index
    %60 = vector.load %arg9[%c48, %c0_57] : memref<64x32xf32, #tpu.memory_space<vmem>>, vector<1x32xf32>
    tpu.vector_store %arg9[%c48, %c0_57], %59 {strides = array<i32>} : memref<64x32xf32, #tpu.memory_space<vmem>>, vector<1x32xf32>,
    %c1_58 = arith.constant 1 : index
    %c6_59 = arith.constant 6 : index
    %61 = memref.load %arg0[%c1_58, %c6_59] : memref<2x8xi32, #tpu.memory_space<smem>>
    %62 = arith.index_cast %61 : i32 to index
    %c0_60 = arith.constant 0 : index
    %63 = vector.load %arg8[%62, %c0_60] : memref<16x32xf32, #tpu.memory_space<vmem>>, vector<1x32xf32>
    %c49 = arith.constant 49 : index
    %c0_61 = arith.constant 0 : index
    %64 = vector.load %arg9[%c49, %c0_61] : memref<64x32xf32, #tpu.memory_space<vmem>>, vector<1x32xf32>
    tpu.vector_store %arg9[%c49, %c0_61], %63 {strides = array<i32>} : memref<64x32xf32, #tpu.memory_space<vmem>>, vector<1x32xf32>,
    %c0_62 = arith.constant 0 : index
    %c7 = arith.constant 7 : index
    %65 = memref.load %arg0[%c0_62, %c7] : memref<2x8xi32, #tpu.memory_space<smem>>
    %66 = arith.index_cast %65 : i32 to index
    %c0_63 = arith.constant 0 : index
    %67 = vector.load %arg8[%66, %c0_63] : memref<16x32xf32, #tpu.memory_space<vmem>>, vector<1x32xf32>
    %c56 = arith.constant 56 : index
    %c0_64 = arith.constant 0 : index
    %68 = vector.load %arg9[%c56, %c0_64] : memref<64x32xf32, #tpu.memory_space<vmem>>, vector<1x32xf32>
    tpu.vector_store %arg9[%c56, %c0_64], %67 {strides = array<i32>} : memref<64x32xf32, #tpu.memory_space<vmem>>, vector<1x32xf32>,
    %c1_65 = arith.constant 1 : index
    %c7_66 = arith.constant 7 : index
    %69 = memref.load %arg0[%c1_65, %c7_66] : memref<2x8xi32, #tpu.memory_space<smem>>
    %70 = arith.index_cast %69 : i32 to index
    %c0_67 = arith.constant 0 : index
    %71 = vector.load %arg8[%70, %c0_67] : memref<16x32xf32, #tpu.memory_space<vmem>>, vector<1x32xf32>
    %c57 = arith.constant 57 : index
    %c0_68 = arith.constant 0 : index
    %72 = vector.load %arg9[%c57, %c0_68] : memref<64x32xf32, #tpu.memory_space<vmem>>, vector<1x32xf32>
    tpu.vector_store %arg9[%c57, %c0_68], %71 {strides = array<i32>} : memref<64x32xf32, #tpu.memory_space<vmem>>, vector<1x32xf32>,
    %cst_69 = arith.constant 0.000000e+00 : f32
    %73 = vector.broadcast %cst_69 : f32 to vector<8x32xf32>
    %c0_70 = arith.constant 0 : index
    %c0_71 = arith.constant 0 : index
    %74 = vector.load %arg9[%c0_70, %c0_71] : memref<64x32xf32, #tpu.memory_space<vmem>>, vector<8x32xf32>
    %c0_72 = arith.constant 0 : index
    %c0_73 = arith.constant 0 : index
    %75 = vector.load %arg4[%c0_72, %c0_73] : memref<32x32xf32, #tpu.memory_space<vmem>>, vector<32x32xf32>
    %cst_74 = arith.constant dense<0.000000e+00> : vector<8x32xf32>
    %76 = tpu.matmul %73, %75, %cst_74 {dimension_numbers = #tpu.dot_dimension_numbers<[1], [0], [0], [1], [0, 0, 1, 1], [], []>} : vector<8x32xf32>, vector<32x32xf32>, vector<8x32xf32> -> vector<8x32xf32>
    %77 = arith.addf %74, %76 : vector<8x32xf32>
    %78 = math.tanh %77 : vector<8x32xf32>
    %c8_75 = arith.constant 8 : index
    %c0_76 = arith.constant 0 : index
    %79 = vector.load %arg9[%c8_75, %c0_76] : memref<64x32xf32, #tpu.memory_space<vmem>>, vector<8x32xf32>
    %c0_77 = arith.constant 0 : index
    %c0_78 = arith.constant 0 : index
    %80 = vector.load %arg4[%c0_77, %c0_78] : memref<32x32xf32, #tpu.memory_space<vmem>>, vector<32x32xf32>
    %cst_79 = arith.constant dense<0.000000e+00> : vector<8x32xf32>
    %81 = tpu.matmul %78, %80, %cst_79 {dimension_numbers = #tpu.dot_dimension_numbers<[1], [0], [0], [1], [0, 0, 1, 1], [], []>} : vector<8x32xf32>, vector<32x32xf32>, vector<8x32xf32> -> vector<8x32xf32>
    %82 = arith.addf %79, %81 : vector<8x32xf32>
    %83 = math.tanh %82 : vector<8x32xf32>
    %c16_80 = arith.constant 16 : index
    %c0_81 = arith.constant 0 : index
    %84 = vector.load %arg9[%c16_80, %c0_81] : memref<64x32xf32, #tpu.memory_space<vmem>>, vector<8x32xf32>
    %c0_82 = arith.constant 0 : index
    %c0_83 = arith.constant 0 : index
    %85 = vector.load %arg4[%c0_82, %c0_83] : memref<32x32xf32, #tpu.memory_space<vmem>>, vector<32x32xf32>
    %cst_84 = arith.constant dense<0.000000e+00> : vector<8x32xf32>
    %86 = tpu.matmul %83, %85, %cst_84 {dimension_numbers = #tpu.dot_dimension_numbers<[1], [0], [0], [1], [0, 0, 1, 1], [], []>} : vector<8x32xf32>, vector<32x32xf32>, vector<8x32xf32> -> vector<8x32xf32>
    %87 = arith.addf %84, %86 : vector<8x32xf32>
    %88 = math.tanh %87 : vector<8x32xf32>
    %c24_85 = arith.constant 24 : index
    %c0_86 = arith.constant 0 : index
    %89 = vector.load %arg9[%c24_85, %c0_86] : memref<64x32xf32, #tpu.memory_space<vmem>>, vector<8x32xf32>
    %c0_87 = arith.constant 0 : index
    %c0_88 = arith.constant 0 : index
    %90 = vector.load %arg4[%c0_87, %c0_88] : memref<32x32xf32, #tpu.memory_space<vmem>>, vector<32x32xf32>
    %cst_89 = arith.constant dense<0.000000e+00> : vector<8x32xf32>
    %91 = tpu.matmul %88, %90, %cst_89 {dimension_numbers = #tpu.dot_dimension_numbers<[1], [0], [0], [1], [0, 0, 1, 1], [], []>} : vector<8x32xf32>, vector<32x32xf32>, vector<8x32xf32> -> vector<8x32xf32>
    %92 = arith.addf %89, %91 : vector<8x32xf32>
    %93 = math.tanh %92 : vector<8x32xf32>
    %c32_90 = arith.constant 32 : index
    %c0_91 = arith.constant 0 : index
    %94 = vector.load %arg9[%c32_90, %c0_91] : memref<64x32xf32, #tpu.memory_space<vmem>>, vector<8x32xf32>
    %c0_92 = arith.constant 0 : index
    %c0_93 = arith.constant 0 : index
    %95 = vector.load %arg4[%c0_92, %c0_93] : memref<32x32xf32, #tpu.memory_space<vmem>>, vector<32x32xf32>
    %cst_94 = arith.constant dense<0.000000e+00> : vector<8x32xf32>
    %96 = tpu.matmul %93, %95, %cst_94 {dimension_numbers = #tpu.dot_dimension_numbers<[1], [0], [0], [1], [0, 0, 1, 1], [], []>} : vector<8x32xf32>, vector<32x32xf32>, vector<8x32xf32> -> vector<8x32xf32>
    %97 = arith.addf %94, %96 : vector<8x32xf32>
    %98 = math.tanh %97 : vector<8x32xf32>
    %c40_95 = arith.constant 40 : index
    %c0_96 = arith.constant 0 : index
    %99 = vector.load %arg9[%c40_95, %c0_96] : memref<64x32xf32, #tpu.memory_space<vmem>>, vector<8x32xf32>
    %c0_97 = arith.constant 0 : index
    %c0_98 = arith.constant 0 : index
    %100 = vector.load %arg4[%c0_97, %c0_98] : memref<32x32xf32, #tpu.memory_space<vmem>>, vector<32x32xf32>
    %cst_99 = arith.constant dense<0.000000e+00> : vector<8x32xf32>
    %101 = tpu.matmul %98, %100, %cst_99 {dimension_numbers = #tpu.dot_dimension_numbers<[1], [0], [0], [1], [0, 0, 1, 1], [], []>} : vector<8x32xf32>, vector<32x32xf32>, vector<8x32xf32> -> vector<8x32xf32>
    %102 = arith.addf %99, %101 : vector<8x32xf32>
    %103 = math.tanh %102 : vector<8x32xf32>
    %c48_100 = arith.constant 48 : index
    %c0_101 = arith.constant 0 : index
    %104 = vector.load %arg9[%c48_100, %c0_101] : memref<64x32xf32, #tpu.memory_space<vmem>>, vector<8x32xf32>
    %c0_102 = arith.constant 0 : index
    %c0_103 = arith.constant 0 : index
    %105 = vector.load %arg4[%c0_102, %c0_103] : memref<32x32xf32, #tpu.memory_space<vmem>>, vector<32x32xf32>
    %cst_104 = arith.constant dense<0.000000e+00> : vector<8x32xf32>
    %106 = tpu.matmul %103, %105, %cst_104 {dimension_numbers = #tpu.dot_dimension_numbers<[1], [0], [0], [1], [0, 0, 1, 1], [], []>} : vector<8x32xf32>, vector<32x32xf32>, vector<8x32xf32> -> vector<8x32xf32>
    %107 = arith.addf %104, %106 : vector<8x32xf32>
    %108 = math.tanh %107 : vector<8x32xf32>
    %c56_105 = arith.constant 56 : index
    %c0_106 = arith.constant 0 : index
    %109 = vector.load %arg9[%c56_105, %c0_106] : memref<64x32xf32, #tpu.memory_space<vmem>>, vector<8x32xf32>
    %c0_107 = arith.constant 0 : index
    %c0_108 = arith.constant 0 : index
    %110 = vector.load %arg4[%c0_107, %c0_108] : memref<32x32xf32, #tpu.memory_space<vmem>>, vector<32x32xf32>
    %cst_109 = arith.constant dense<0.000000e+00> : vector<8x32xf32>
    %111 = tpu.matmul %108, %110, %cst_109 {dimension_numbers = #tpu.dot_dimension_numbers<[1], [0], [0], [1], [0, 0, 1, 1], [], []>} : vector<8x32xf32>, vector<32x32xf32>, vector<8x32xf32> -> vector<8x32xf32>
    %112 = arith.addf %109, %111 : vector<8x32xf32>
    %113 = math.tanh %112 : vector<8x32xf32>
    %c0_110 = arith.constant 0 : index
    %c0_111 = arith.constant 0 : index
    %114 = vector.load %arg5[%c0_110, %c0_111] : memref<32x16xf32, #tpu.memory_space<vmem>>, vector<32x16xf32>
    %cst_112 = arith.constant dense<0.000000e+00> : vector<8x16xf32>
    %115 = tpu.matmul %113, %114, %cst_112 {dimension_numbers = #tpu.dot_dimension_numbers<[1], [0], [0], [1], [0, 0, 1, 1], [], []>} : vector<8x32xf32>, vector<32x16xf32>, vector<8x16xf32> -> vector<8x16xf32>
    %c0_113 = arith.constant 0 : index
    %c0_114 = arith.constant 0 : index
    %116 = vector.load %arg6[%c0_113, %c0_114] : memref<1x16xf32, #tpu.memory_space<vmem>>, vector<1x16xf32>
    %117 = vector.broadcast %116 : vector<1x16xf32> to vector<8x16xf32>
    %118 = arith.addf %115, %117 : vector<8x16xf32>
    %c0_115 = arith.constant 0 : index
    %c0_116 = arith.constant 0 : index
    %119 = vector.load %arg7[%c0_115, %c0_116] : memref<8x16xf32, #tpu.memory_space<vmem>>, vector<8x16xf32>
    tpu.vector_store %arg7[%c0_115, %c0_116], %118 {strides = array<i32>} : memref<8x16xf32, #tpu.memory_space<vmem>>, vector<8x16xf32>,
    return
  }
}

</mosaic_0001>

<bundles_post_ra>
// kernel: tpu_custom_call.1
= control target key start
LH: loop header
LB: loop body
LE: loop exit
PB: predicated region body
PF: predicated region fallthrough
CT: control target
= control target key end

     0   :  { %12 = vsyncpa [#allocation7], 0  ;;  %s1592_s0 = inlined_call_operand.vmem [shape: s32[2,8], index: 0, kind: input, shape index: {}]   ;;  %s1593_s1 = inlined_call_operand.vmem [shape: f32[16,32], index: 1, kind: input, shape index: {}]   ;;  %s1594_s2 = inlined_call_operand.vmem [shape: f32[32,32], index: 2, kind: input, shape index: {}]   ;;  %s1595_s3 = inlined_call_operand.hbm [shape: f32[1,32], index: 3, kind: input, shape index: {}]   ;;  %s1596_s4 = inlined_call_operand.hbm [shape: f32[32,32], index: 4, kind: input, shape index: {}]   ;;  %s1597_s5 = inlined_call_operand.vmem [shape: f32[32,16], index: 5, kind: input, shape index: {}]   ;;  %s1598_s6 = inlined_call_operand.vmem [shape: f32[1,16], index: 6, kind: input, shape index: {}]   ;;  %s1599_s7 = inlined_call_operand.hbm [shape: f32[8,16], index: 7, kind: output, shape index: {}]  }
   0x1   :  { %13 = vsyncpa [#allocation5], 0 }
   0x2   :  { %14 = vsyncpa [#allocation10], 0 }
   0x3   :  { %15 = vsyncpa [#allocation6], 0  ;;  %s22_s26 = sshll.u32 %s1592_s0, 4  ;;  %s23_s26 = int_to_ptr.vmem [resolvable:$true] %s22_s26 }
   0x4   :  { %s1242_s27 = scalar_lea.vmem %s23_s26, 32  ;;  %p1247_p1 = scmp.lt.s32.totalorder %s23_s26, %s23_s26 }
   0x5   :  { %p1243_p0 = scmp.ne.s32.totalorder %s23_s26, %s1242_s27  ;;  %p1248_p2 = scmp.lt.s32.totalorder %s1242_s27, %s1242_s27 }
   0x7   :  { %p1249_p3 = por %p1248_p2, %p1247_p1 }
   0x9   :  { %p1250_p4 = pnand %p1249_p3, %p1243_p0 }
   0xb   :  { %1253 = shalt.err (!%p1250_p4)
}
   0xc   :  { %s1328_s28 = smov [#allocation4]   ;;  %s1329_s29 = smov [#allocation8]  }
   0xd   :  { %25 = dma.vmem_to_smem %s23_s26, 32, %s1328_s28, [#allocation7]  }
   0xe   :  { %s36_s30 = sshll.u32 %s1329_s29, 4  ;;  %s1330_s8 = smov [#allocation9]   ;;  %s37_s30 = int_to_ptr.vmem [resolvable:$true] %s36_s30 }
   0xf   :  { %s45_s9 = sshll.u32 %s1330_s8, 4  ;;  %s1254_s12 = scalar_lea.hbm %s1595_s3, 16  ;;  %s46_s9 = int_to_ptr.vmem [resolvable:$true] %s45_s9 }
  0x10   :  { %p1255_p5 = scmp.ne.s32.totalorder %s1595_s3, %s1254_s12  ;;  %p1258_p6 = scmp.lt.u32.totalorder %s1254_s12, %s1595_s3 }
  0x12   :  { %p1260_p7 = pnand %p1258_p6, %p1255_p5 }
  0x14   :  { %1263 = shalt.err (!%p1260_p7)
}
  0x15   :  { %s1264_s16 = scalar_lea.vmem %s37_s30, 16  ;;  %s1268_s17 = scalar_lea.vmem %s37_s30, 32 }
  0x16   :  { %p1265_p8 = scmp.ne.s32.totalorder %s37_s30, %s1264_s16  ;;  %p1269_p9 = scmp.lt.s32.totalorder %s37_s30, %s37_s30 }
  0x17   :  { %p1270_p10 = scmp.lt.s32.totalorder %s1268_s17, %s1264_s16 }
  0x19   :  { %p1271_p11 = por %p1270_p10, %p1269_p9 }
  0x1b   :  { %p1272_p12 = pnand %p1271_p11, %p1265_p8 }
  0x1d   :  { %1275 = shalt.err (!%p1272_p12)
}
  0x1e   :  { %39 = dma.hbm_to_vmem [thread:$0]  %s1595_s3, 16, %s37_s30, [#allocation5]  }
  0x1f   :  { %s1276_s22 = scalar_lea.hbm %s1596_s4, 512 }
  0x20   :  { %p1277_p13 = scmp.ne.s32.totalorder %s1596_s4, %s1276_s22  ;;  %p1280_p0 = scmp.lt.u32.totalorder %s1276_s22, %s1596_s4 }
  0x22   :  { %p1282_p1 = pnand %p1280_p0, %p1277_p13 }
  0x24   :  { %1285 = shalt.err (!%p1282_p1)
}
  0x25   :  { %s1286_s27 = scalar_lea.vmem %s46_s9, 512  ;;  %p1291_p3 = scmp.lt.s32.totalorder %s46_s9, %s46_s9 }
  0x26   :  { %p1287_p2 = scmp.ne.s32.totalorder %s46_s9, %s1286_s27  ;;  %p1292_p4 = scmp.lt.s32.totalorder %s1286_s27, %s1286_s27 }
  0x28   :  { %p1293_p5 = por %p1292_p4, %p1291_p3 }
  0x2a   :  { %p1294_p6 = pnand %p1293_p5, %p1287_p2 }
  0x2c   :  { %1297 = shalt.err (!%p1294_p6)
}
  0x2d   :  { %s1331_s3 = smov 128   ;;  %s1332_s28 = smov 8  }
  0x2e   :  { %51 = dma.hbm_to_vmem [thread:$0]  %s1596_s4, 512, %s46_s9, [#allocation10], %s1331_s3, %s1331_s3, %s1332_s28  }
  0x2f   :  { %1320 = dma.done.wait [#allocation7], 32  }
  0x30   :  { %1321 = vsyncadd [#allocation7], 4294967264 }
  0x31   :  { %1322 = dma.done.wait [#allocation5], 16  }
  0x32   :  { %1323 = vsyncadd [#allocation5], 4294967280 }
  0x33   :  { %1324 = dma.done.wait [#allocation10], 512  }
  0x34   :  { %1325 = vsyncadd [#allocation10], 4294966784 }
  0x35   :  { %65 = sfence }
  0x36   :  { %v68_v0 = vld [vmem:[%s1594_s2] sm:$0xff]  ;;  %v69_v1 = vld [vmem:[%s1594_s2 + $0x8] sm:$0xff]  ;;  %v70_v2 = vld [vmem:[%s1594_s2 + $0x10] sm:$0xff]  ;;  %vm79_vm0 = vcmask 261120   ;;  %v1333_v6 = vmov 0.0|0.0   ;;  %v1334_v7 = vmov 0.0  }
  0x37   :  { %v1155_v3 = vpack.c.bf16 %v69_v1, %v68_v0  ;;  %v71_v4 = vld [vmem:[%s1594_s2 + $0x18] sm:$0xff]  ;;  %v66_v5 = vld [vmem:[%s1593_s1] sm:$0xff]  ;;  %1163 = vmatprep.subr.bf16.mxu1 %v1333_v6  ;;  %163 = vst.msk [vmem:[#allocation3] sm:$0xff] %vm79_vm0, %v1334_v7  ;;  %164 = vst.msk [vmem:[#allocation3 + $0x8] sm:$0xff] %vm79_vm0, %v1334_v7  ;;  %vm1335_vm1 = vmmov 0   ;;  %s970_s17 = sld [smem:[#allocation4 + $0x80]] }
  0x38   :  { %165 = vst.msk [vmem:[#allocation3 + $0x10] sm:$0xff] %vm79_vm0, %v1334_v7  ;;  %166 = vst.msk [vmem:[#allocation3 + $0x18] sm:$0xff] %vm79_vm0, %v1334_v7  ;;  %v1159_v8 = vpack.c.bf16 %v71_v4, %v70_v2  ;;  %1053 = vmatprep.mubr.msk.f32.mxu0 %vm79_vm0, %v66_v5  ;;  %v237_v9 = vld [vmem:[#allocation9] sm:$0xff]  ;;  %v238_v10 = vld [vmem:[#allocation9 + $0x8] sm:$0xff]  ;;  %1064 = vmatprep.mubr.msk.f32.mxu1 %vm1335_vm1, %v1334_v7  ;;  %s1465_s18 = sld [smem:[#allocation4 + $0x1]]  ;;  %s1469_s20 = sld [smem:[#allocation4 + $0x2]] }
  0x39   :  { %167 = vst.msk [vmem:[#allocation3 + $0x20] sm:$0xff] %vm79_vm0, %v1334_v7  ;;  %168 = vst.msk [vmem:[#allocation3 + $0x28] sm:$0xff] %vm79_vm0, %v1334_v7  ;;  %v239_v11 = vld [vmem:[#allocation9 + $0x10] sm:$0xff]  ;;  %1156 = vmatprep.subr.bf16.mxu0 %v1155_v3  ;;  %v1439_v12 = vpack.c.bf16 %v238_v10, %v237_v9  ;;  %v240_v13 = vld [vmem:[#allocation9 + $0x18] sm:$0xff]  ;;  %s1467_s19 = sld [smem:[#allocation4 + $0x81]]  ;;  %s1471_s21 = sld [smem:[#allocation4 + $0x82]] }
  0x3a   :  { %169 = vst.msk [vmem:[#allocation3 + $0x30] sm:$0xff] %vm79_vm0, %v1334_v7  ;;  %170 = vst.msk [vmem:[#allocation3 + $0x38] sm:$0xff] %vm79_vm0, %v1334_v7  ;;  %1158 = vmatpush3.bf16.msra.mxu0 %v1155_v3  ;;  %v1442_v14 = vpack.c.bf16 %v240_v13, %v239_v11  ;;  %v67_v15 = vld [vmem:[%s1593_s1 + $0x8] sm:$0xff]  ;;  %s171_s1 = sld [smem:[#allocation4]]  ;;  %v967_v16 = vld [vmem:[#allocation8] ss:$0 sm:$0xff] }
  0x3b   :  { %1160 = vmatprep.subr.bf16.mxu0 %v1159_v8  ;;  %1165 = vmatpush3.bf16.msra.mxu1 %v1439_v12  ;;  %s1473_s22 = sld [smem:[#allocation4 + $0x3]]  ;;  %s1477_s24 = sld [smem:[#allocation4 + $0x4]]  ;;  %vm174_vm2 = vcmask 253952   ;;  %v848_v10 = vld [vmem:[%s1597_s5] sm:$0xff]  ;;  %v849_v11 = vld [vmem:[%s1597_s5 + $0x8] sm:$0xff]  ;;  %v851_v13 = vld [vmem:[%s1597_s5 + $0x18] sm:$0xff] }
  0x3c   :  { %1166 = vmatprep.subr.bf16.mxu1 %v1333_v6  ;;  %s1475_s23 = sld [smem:[#allocation4 + $0x83]]  ;;  %s1479_s25 = sld [smem:[#allocation4 + $0x84]]  ;;  %vm932_vm3 = vcmask 130048  }
  0x3d   :  { %s1481_s26 = sld [smem:[#allocation4 + $0x5]]  ;;  %s1485_s3 = sld [smem:[#allocation4 + $0x6]] }
  0x3e   :  { %1162 = vmatpush3.bf16.msra.mxu0 %v1159_v8  ;;  %s1483_s27 = sld [smem:[#allocation4 + $0x85]]  ;;  %s1487_s28 = sld [smem:[#allocation4 + $0x86]] }
  0x3f   :  { %1168 = vmatpush3.bf16.msra.mxu1 %v1442_v14  ;;  %1169 = vmatprep.subr.bf16.mxu0 %v1333_v6  ;;  %s1489_s29 = sld [smem:[#allocation4 + $0x7]]  ;;  %s177_s10 = scalar_lea.vmem [#allocation2], %s970_s17 }
  0x40   :  { %1175 = vmatprep.subr.bf16.mxu1 %v1333_v6  ;;  %s1491_s30 = sld [smem:[#allocation4 + $0x87]]  ;;  %s172_s8 = scalar_lea.vmem [#allocation2], %s171_s1 }
  0x41   :  { %1054 = vmatmul.mubr.msk.f32.vlgmr.msra.gmra.mrb[0].mxu0 %vm79_vm0, %v67_v15  ;;  %s181_s11 = scalar_lea.vmem [#allocation2], %s1465_s18  ;;  %s185_s12 = scalar_lea.vmem [#allocation2], %s1467_s19 }
  0x42   :  { %1065 = vmatmul.mubr.f32.vlgmr.msra.gmra.mrb[0].mxu1 %v1334_v7  ;;  %1171 = vmatpush3.bf16.msra.mxu0 %v1439_v12  ;;  %s189_s0 = scalar_lea.vmem [#allocation2], %s1469_s20  ;;  %s193_s13 = scalar_lea.vmem [#allocation2], %s1471_s21 }
  0x43   :  { %1172 = vmatprep.subr.bf16.mxu0 %v1333_v6  ;;  %1075 = vmatprep.mubr.msk.f32.mxu0 %vm1335_vm1, %v1334_v7  ;;  %s197_s4 = scalar_lea.vmem [#allocation2], %s1473_s22  ;;  %s201_s9 = scalar_lea.vmem [#allocation2], %s1475_s23 }
  0x44   :  { %1177 = vmatpush3.bf16.msra.mxu1 %v1439_v12  ;;  %1086 = vmatprep.mubr.msk.f32.mxu1 %vm1335_vm1, %v1334_v7  ;;  %s205_s14 = scalar_lea.vmem [#allocation2], %s1477_s24  ;;  %s209_s15 = scalar_lea.vmem [#allocation2], %s1479_s25 }
  0x45   :  { %1178 = vmatprep.subr.bf16.mxu1 %v1333_v6  ;;  %s213_s2 = scalar_lea.vmem [#allocation2], %s1481_s26  ;;  %s217_s16 = scalar_lea.vmem [#allocation2], %s1483_s27 }
  0x46   :  { %1174 = vmatpush3.bf16.msra.mxu0 %v1442_v14  ;;  %s221_s1 = scalar_lea.vmem [#allocation2], %s1485_s3  ;;  %s225_s17 = scalar_lea.vmem [#allocation2], %s1487_s28 }
  0x47   :  { %1181 = vmatprep.subr.bf16.mxu0 %v1333_v6  ;;  %s229_s18 = scalar_lea.vmem [#allocation2], %s1489_s29  ;;  %s233_s19 = scalar_lea.vmem [#allocation2], %s1491_s30 }
  0x48   :  { %1180 = vmatpush3.bf16.msra.mxu1 %v1442_v14  ;;  %s1336_s29 = smov [#allocation11]  }
  0x49   :  { %1187 = vmatprep.subr.bf16.mxu1 %v1333_v6  ;;  %s940_s30 = sshll.u32 %s1336_s29, 4  ;;  %s941_s30 = int_to_ptr.vmem [resolvable:$true] %s940_s30 }
  0x4a   :  { %p1303_p8 = scmp.lt.s32.totalorder %s941_s30, %s941_s30 }
 0x114   :  { %v1055_v17 = vpop.f32.mrb[0].mxu0 }
 0x115   :  { %v158_v18 = vadd.f32 %v1055_v17, %v967_v16  ;;  %v152_v19 = vpop.f32.mrb[1].mxu0  ;;  %v310_v20 = vpop.f32.mrb[0].mxu1 }
 0x116   :  { %v153_v21 = vadd.f32 %v967_v16, %v152_v19  ;;  %v1066_v22 = vpop.f32.mrb[1].mxu1 }
 0x117   :  { %162 = vst.msk [vmem:[#allocation2 + $0x8] sm:$0xff] %vm79_vm0, %v158_v18 }
 0x118   :  { %161 = vst.msk [vmem:[#allocation2] sm:$0xff] %vm79_vm0, %v153_v21 }
 0x11f   :  { %v173_v23 = vld [vmem:[%s172_s8] sm:$0x1] }
 0x120   :  { %v178_v24 = vld [vmem:[%s177_s10] sm:$0x1]  ;;  %175 = vst.msk [vmem:[#allocation3] sm:$0x1] %vm174_vm2, %v173_v23 }
 0x121   :  { %v182_v25 = vld [vmem:[%s181_s11] sm:$0x1]  ;;  %179 = vst.msk [vmem:[#allocation3 + $0x1] sm:$0x1] %vm174_vm2, %v178_v24 }
 0x122   :  { %v186_v26 = vld [vmem:[%s185_s12] sm:$0x1]  ;;  %183 = vst.msk [vmem:[#allocation3 + $0x8] sm:$0x1] %vm174_vm2, %v182_v25 }
 0x123   :  { %v190_v27 = vld [vmem:[%s189_s0] sm:$0x1]  ;;  %187 = vst.msk [vmem:[#allocation3 + $0x9] sm:$0x1] %vm174_vm2, %v186_v26 }
 0x124   :  { %v194_v28 = vld [vmem:[%s193_s13] sm:$0x1]  ;;  %191 = vst.msk [vmem:[#allocation3 + $0x10] sm:$0x1] %vm174_vm2, %v190_v27 }
 0x125   :  { %v198_v29 = vld [vmem:[%s197_s4] sm:$0x1]  ;;  %195 = vst.msk [vmem:[#allocation3 + $0x11] sm:$0x1] %vm174_vm2, %v194_v28 }
 0x126   :  { %v202_v30 = vld [vmem:[%s201_s9] sm:$0x1]  ;;  %199 = vst.msk [vmem:[#allocation3 + $0x18] sm:$0x1] %vm174_vm2, %v198_v29 }
 0x127   :  { %v206_v31 = vld [vmem:[%s205_s14] sm:$0x1]  ;;  %203 = vst.msk [vmem:[#allocation3 + $0x19] sm:$0x1] %vm174_vm2, %v202_v30 }
 0x128   :  { %v210_v32 = vld [vmem:[%s209_s15] sm:$0x1]  ;;  %207 = vst.msk [vmem:[#allocation3 + $0x20] sm:$0x1] %vm174_vm2, %v206_v31  ;;  %v236_v39 = vld [vmem:[#allocation3] sm:$0xff] }
 0x129   :  { %v214_v33 = vld [vmem:[%s213_s2] sm:$0x1]  ;;  %211 = vst.msk [vmem:[#allocation3 + $0x21] sm:$0x1] %vm174_vm2, %v210_v32  ;;  %v314_v40 = vadd.f32 %v310_v20, %v236_v39 }
 0x12a   :  { %v218_v34 = vld [vmem:[%s217_s16] sm:$0x1]  ;;  %215 = vst.msk [vmem:[#allocation3 + $0x28] sm:$0x1] %vm174_vm2, %v214_v33  ;;  %v316_v42 = vld [vmem:[#allocation3 + $0x8] sm:$0xff] }
 0x12b   :  { %v222_v35 = vld [vmem:[%s221_s1] sm:$0x1]  ;;  %219 = vst.msk [vmem:[#allocation3 + $0x29] sm:$0x1] %vm174_vm2, %v218_v34  ;;  %1226 = vtanh.f32 %v314_v40 }
 0x12c   :  { %v226_v36 = vld [vmem:[%s225_s17] sm:$0x1]  ;;  %223 = vst.msk [vmem:[#allocation3 + $0x30] sm:$0x1] %vm174_vm2, %v222_v35 }
 0x12d   :  { %v230_v37 = vld [vmem:[%s229_s18] sm:$0x1]  ;;  %227 = vst.msk [vmem:[#allocation3 + $0x31] sm:$0x1] %vm174_vm2, %v226_v36 }
 0x12e   :  { %v234_v38 = vld [vmem:[%s233_s19] sm:$0x1]  ;;  %231 = vst.msk [vmem:[#allocation3 + $0x38] sm:$0x1] %vm174_vm2, %v230_v37  ;;  %v468_v52 = vld [vmem:[#allocation3 + $0x18] sm:$0xff] }
 0x12f   :  { %235 = vst.msk [vmem:[#allocation3 + $0x39] sm:$0x1] %vm174_vm2, %v234_v38  ;;  %v392_v47 = vld [vmem:[#allocation3 + $0x10] sm:$0xff] }
 0x130   :  { %v544_v57 = vld [vmem:[#allocation3 + $0x20] sm:$0xff]  ;;  %v992_v20 = vld [vmem:[%s1598_s6] ss:$0 sm:$0xff] }
 0x132   :  { %v620_v62 = vld [vmem:[#allocation3 + $0x28] sm:$0xff] }
 0x134   :  { %v696_v3 = vld [vmem:[#allocation3 + $0x30] sm:$0xff] }
 0x135   :  { %v1227_v41 = vpop.eup %1226 }
 0x136   :  { %1076 = vmatmul.mubr.msk.f32.vlgmr.msra.gmra.mrb[2].mxu0 %vm79_vm0, %v1227_v41  ;;  %v772_v15 = vld [vmem:[#allocation3 + $0x38] sm:$0xff] }
 0x137   :  { %1183 = vmatpush3.bf16.msra.mxu0 %v1439_v12  ;;  %1097 = vmatprep.mubr.msk.f32.mxu0 %vm1335_vm1, %v1334_v7 }
 0x138   :  { %1184 = vmatprep.subr.bf16.mxu0 %v1333_v6 }
 0x13b   :  { %1186 = vmatpush3.bf16.msra.mxu0 %v1442_v14 }
 0x13c   :  { %1193 = vmatprep.subr.bf16.mxu0 %v1333_v6 }
 0x209   :  { %v386_v43 = vpop.f32.mrb[2].mxu0 }
 0x20a   :  { %v390_v44 = vadd.f32 %v386_v43, %v316_v42  ;;  %v1077_v45 = vpop.f32.mrb[3].mxu0 }
 0x20c   :  { %1228 = vtanh.f32 %v390_v44 }
 0x216   :  { %v1229_v46 = vpop.eup %1228 }
 0x217   :  { %1087 = vmatmul.mubr.msk.f32.vlgmr.msra.gmra.mrb[2].mxu1 %vm79_vm0, %v1229_v46 }
 0x218   :  { %1189 = vmatpush3.bf16.msra.mxu1 %v1439_v12  ;;  %1108 = vmatprep.mubr.msk.f32.mxu1 %vm1335_vm1, %v1334_v7 }
 0x219   :  { %1190 = vmatprep.subr.bf16.mxu1 %v1333_v6 }
 0x21c   :  { %1192 = vmatpush3.bf16.msra.mxu1 %v1442_v14 }
 0x21d   :  { %1199 = vmatprep.subr.bf16.mxu1 %v1333_v6 }
 0x2ea   :  { %v462_v48 = vpop.f32.mrb[2].mxu1 }
 0x2eb   :  { %v466_v49 = vadd.f32 %v462_v48, %v392_v47  ;;  %v1088_v50 = vpop.f32.mrb[3].mxu1 }
 0x2ed   :  { %1230 = vtanh.f32 %v466_v49 }
 0x2f7   :  { %v1231_v51 = vpop.eup %1230 }
 0x2f8   :  { %1098 = vmatmul.mubr.msk.f32.vlgmr.msra.gmra.mrb[4].mxu0 %vm79_vm0, %v1231_v51 }
 0x2f9   :  { %1195 = vmatpush3.bf16.msra.mxu0 %v1439_v12  ;;  %1119 = vmatprep.mubr.msk.f32.mxu0 %vm1335_vm1, %v1334_v7 }
 0x2fa   :  { %1196 = vmatprep.subr.bf16.mxu0 %v1333_v6 }
 0x2fd   :  { %1198 = vmatpush3.bf16.msra.mxu0 %v1442_v14 }
 0x2fe   :  { %1205 = vmatprep.subr.bf16.mxu0 %v1333_v6 }
 0x3cb   :  { %v538_v53 = vpop.f32.mrb[4].mxu0 }
 0x3cc   :  { %v542_v54 = vadd.f32 %v538_v53, %v468_v52  ;;  %v1099_v55 = vpop.f32.mrb[5].mxu0 }
 0x3ce   :  { %1232 = vtanh.f32 %v542_v54 }
 0x3d8   :  { %v1233_v56 = vpop.eup %1232 }
 0x3d9   :  { %1109 = vmatmul.mubr.msk.f32.vlgmr.msra.gmra.mrb[4].mxu1 %vm79_vm0, %v1233_v56 }
 0x3da   :  { %1201 = vmatpush3.bf16.msra.mxu1 %v1439_v12  ;;  %1130 = vmatprep.mubr.msk.f32.mxu1 %vm1335_vm1, %v1334_v7 }
 0x3db   :  { %1202 = vmatprep.subr.bf16.mxu1 %v1333_v6 }
 0x3de   :  { %1204 = vmatpush3.bf16.msra.mxu1 %v1442_v14 }
 0x3df   :  { %1211 = vmatprep.subr.bf16.mxu1 %v1333_v6 }
 0x4ac   :  { %v614_v58 = vpop.f32.mrb[4].mxu1 }
 0x4ad   :  { %v618_v59 = vadd.f32 %v614_v58, %v544_v57  ;;  %v1110_v60 = vpop.f32.mrb[5].mxu1 }
 0x4af   :  { %1234 = vtanh.f32 %v618_v59 }
 0x4b9   :  { %v1235_v61 = vpop.eup %1234 }
 0x4ba   :  { %1120 = vmatmul.mubr.msk.f32.vlgmr.msra.gmra.mrb[6].mxu0 %vm79_vm0, %v1235_v61 }
 0x4bb   :  { %1207 = vmatpush3.bf16.msra.mxu0 %v1439_v12  ;;  %1141 = vmatprep.mubr.msk.f32.mxu0 %vm1335_vm1, %v1334_v7  ;;  %v1212_v12 = vpack.c.bf16 %v849_v11, %v848_v10 }
 0x4bc   :  { %1208 = vmatprep.subr.bf16.mxu0 %v1333_v6 }
 0x4bf   :  { %1210 = vmatpush3.bf16.msra.mxu0 %v1442_v14 }
 0x58d   :  { %v690_v63 = vpop.f32.mrb[6].mxu0 }
 0x58e   :  { %v694_v0 = vadd.f32 %v690_v63, %v620_v62  ;;  %v1121_v1 = vpop.f32.mrb[7].mxu0 }
 0x590   :  { %1236 = vtanh.f32 %v694_v0 }
 0x59a   :  { %v1237_v2 = vpop.eup %1236 }
 0x59b   :  { %1131 = vmatmul.mubr.msk.f32.vlgmr.msra.gmra.mrb[6].mxu1 %vm79_vm0, %v1237_v2 }
 0x59c   :  { %1152 = vmatprep.mubr.msk.f32.mxu1 %vm1335_vm1, %v1334_v7  ;;  %v850_v7 = vld [vmem:[%s1597_s5 + $0x10] sm:$0xff]  ;;  %1213 = vmatpush3.bf16.msra.mxu1 %v1212_v12  ;;  %s1298_s5 = scalar_lea.vmem %s941_s30, 128 }
 0x59d   :  { %v1215_v14 = vpack.c.bf16 %v851_v13, %v850_v7  ;;  %1214 = vmatprep.subr.bf16.mxu1 %v1333_v6  ;;  %p1299_p7 = scmp.ne.s32.totalorder %s941_s30, %s1298_s5  ;;  %p1304_p9 = scmp.lt.s32.totalorder %s1298_s5, %s1298_s5 }
 0x59f   :  { %p1305_p10 = por %p1304_p9, %p1303_p8 }
 0x5a0   :  { %1216 = vmatpush3.bf16.msra.mxu1 %v1215_v14 }
 0x5a1   :  { %p1306_p11 = pnand %p1305_p10, %p1299_p7 }
 0x66e   :  { %v766_v4 = vpop.f32.mrb[6].mxu1 }
 0x66f   :  { %v770_v5 = vadd.f32 %v766_v4, %v696_v3  ;;  %v1132_v8 = vpop.f32.mrb[7].mxu1 }
 0x671   :  { %1238 = vtanh.f32 %v770_v5 }
 0x67b   :  { %v1239_v9 = vpop.eup %1238 }
 0x67c   :  { %1142 = vmatmul.mubr.msk.f32.vlgmr.msra.gmra.mrb[8].mxu0 %vm79_vm0, %v1239_v9 }
 0x74f   :  { %v842_v16 = vpop.f32.mrb[8].mxu0 }
 0x750   :  { %v846_v17 = vadd.f32 %v842_v16, %v772_v15  ;;  %v1143_v18 = vpop.f32.mrb[9].mxu0 }
 0x752   :  { %1240 = vtanh.f32 %v846_v17 }
 0x75c   :  { %v1241_v19 = vpop.eup %1240 }
 0x75d   :  { %1153 = vmatmul.mubr.msk.f32.vlgmr.msra.gmra.mrb[8].mxu1 %vm79_vm0, %v1241_v19 }
 0x830   :  { %v928_v21 = vpop.f32.mrb[8].mxu1 }
 0x831   :  { %v929_v22 = vadd.f32 %v992_v20, %v928_v21  ;;  %v1154_v23 = vpop.f32.mrb[9].mxu1 }
 0x833   :  { %933 = vst.msk [vmem:[#allocation11] sm:$0xff] %vm932_vm3, %v929_v22 }
 0x834   :  { %1309 = shalt.err (!%p1306_p11)
}
 0x835   :  { %s1310_s11 = scalar_lea.hbm %s1599_s7, 128 }
 0x836   :  { %p1311_p12 = scmp.ne.s32.totalorder %s1599_s7, %s1310_s11  ;;  %p1314_p13 = scmp.lt.u32.totalorder %s1310_s11, %s1599_s7 }
 0x838   :  { %p1316_p0 = pnand %p1314_p13, %p1311_p12 }
 0x83a   :  { %1319 = shalt.err (!%p1316_p0)
}
 0x83b   :  { %943 = dma.vmem_to_hbm [thread:$0]  %s941_s30, 128, %s1599_s7, [#allocation6]  }
 0x83c   :  { %1326 = dma.done.wait [#allocation6], 128  }
 0x83d   :  { %1327 = vsyncadd [#allocation6], 4294967168 }
 0x83e   :  { %947 = vsyncpa [#allocation5], 1 }
 0x83f   :  { %948 = vsyncpa [#allocation10], 1 }
 0x840   :  { %949 = vsyncpa [#allocation6], 1 }
 0x841   :  { %950 = vsyncpa [#allocation7], 1 }

</bundles_post_ra>
